<compile_context>
chip_gen: v7x
topology: tpu7x:2x2x1
jax: 0.10.0
libtpu: 0.0.40
codegen_flags: <defaults>
</compile_context>

<pallas_src>
import jax
import jax.numpy as jnp
from jax import lax
from jax.experimental import pallas as pl
from jax.experimental.pallas import tpu as pltpu

_NEG = -1e30  # "-inf equivalent" for padded class columns (no inf arithmetic)


def _round_up(n, m):
    return ((n + m - 1) // m) * m


def classifier_kernel(x_ref, w1_ref, b1_ref, w2_ref, b2_ref, o_ref):
    # Single bf16 cast of the activation tile for the MXU-native path.
    x = x_ref[...].astype(jnp.bfloat16)

    # fc1: weights are (HP, IN) in PyTorch layout; contract dim 1 of both
    # operands (no wrapper-side transpose / layout copy). f32 accumulate.
    h = lax.dot_general(x, w1_ref[...], (((1,), (1,)), ((), ())),
                        preferred_element_type=jnp.float32)
    h = jnp.maximum(h + b1_ref[...], 0.0)            # bias + ReLU in f32

    # fc2: (TB, HP) x (CP, HP) -> (TB, CP=128) lane-dense logits tile.
    logits = lax.dot_general(h.astype(jnp.bfloat16), w2_ref[...],
                             (((1,), (1,)), ((), ())),
                             preferred_element_type=jnp.float32)
    logits = logits + b2_ref[...]                    # padded cols get -1e30 bias

    # Stable log_softmax over the class axis; padded columns exp() to 0 and
    # are sliced off by the wrapper.
    m = jnp.max(logits, axis=-1, keepdims=True)
    lse = m + jnp.log(jnp.sum(jnp.exp(logits - m), axis=-1, keepdims=True))
    o_ref[...] = (logits - lse).astype(o_ref.dtype)


def prepare_params(w1, b1, w2, b2):
    """One-time (init-time) parameter prep: pad hidden/class dims to 128 and
    cast weights to bf16.  PyTorch (out_features, in_features) layout kept."""
    hidden, in_size = w1.shape
    num_classes = w2.shape[0]
    HP = _round_up(hidden, 128)
    CP = _round_up(num_classes, 128)

    w1p = jnp.zeros((HP, in_size), jnp.bfloat16).at[:hidden, :].set(
        w1.astype(jnp.bfloat16))
    b1p = jnp.zeros((1, HP), jnp.float32).at[0, :hidden].set(
        b1.astype(jnp.float32))
    w2p = jnp.zeros((CP, HP), jnp.bfloat16).at[:num_classes, :hidden].set(
        w2.astype(jnp.bfloat16))
    b2p = jnp.full((1, CP), _NEG, jnp.float32).at[0, :num_classes].set(
        b2.astype(jnp.float32))
    return w1p, b1p, w2p, b2p


def classifier_apply(x, w1p, b1p, w2p, b2p, num_classes):
    B, in_size = x.shape
    HP = w1p.shape[0]
    CP = w2p.shape[0]

    # Batch tile: multiple of 8 sublanes, capped so the working set (tile +
    # VMEM-resident weights, double-buffered x/out) stays well inside VMEM
    # even on v7x's 64 MiB.
    TB = min(256, _round_up(B, 8))
    Bp = _round_up(B, TB)
    if Bp != B:
        x = jnp.pad(x, ((0, Bp - B), (0, 0)))
    grid = (Bp // TB,)

    full = lambda i: (0, 0)       # weights/biases: same block every grid step
    cost = pl.CostEstimate(
        flops=2 * Bp * (in_size * HP + HP * CP),
        transcendentals=Bp * (CP + 1),
        bytes_accessed=4 * Bp * (in_size + CP) + 2 * (HP * in_size + CP * HP)
        + 4 * (HP + CP),
    )

    out = pl.pallas_call(
        classifier_kernel,
        out_shape=jax.ShapeDtypeStruct((Bp, CP), jnp.float32),
        grid=grid,
        in_specs=[
            pl.BlockSpec((TB, in_size), lambda i: (i, 0)),   # x tile
            pl.BlockSpec((HP, in_size), full),               # w1 (resident)
            pl.BlockSpec((1, HP), full),                     # b1
            pl.BlockSpec((CP, HP), full),                    # w2 (resident)
            pl.BlockSpec((1, CP), full),                     # b2
        ],
        out_specs=pl.BlockSpec((TB, CP), lambda i: (i, 0)),
        compiler_params=pltpu.CompilerParams(
            dimension_semantics=("parallel",),               # megacore on v7x
        ),
        cost_estimate=cost,
    )(x, w1p, b1p, w2p, b2p)

    return out[:B, :num_classes]


def classifier_forward(x, w1, b1, w2, b2):
    """x: (B, input_size); w1: (hidden, input_size); b1: (hidden,);
       w2: (num_classes, hidden); b2: (num_classes,). Returns (B, num_classes)
       log-probabilities. (prepare_params can be hoisted to init time.)"""
    num_classes = w2.shape[0]
    params = prepare_params(w1, b1, w2, b2)
    return classifier_apply(x, *params, num_classes)


if __name__ == "__main__":
    # small shapes consistent with the module: batch=8, input=32, hidden=32, classes=16
    batch, input_size, hidden_size, num_classes = 8, 32, 32, 16

    key = jax.random.PRNGKey(0)
    kx, k1, k2, k3, k4 = jax.random.split(key, 5)

    x = jax.random.normal(kx, (batch, input_size), dtype=jnp.float32)

    # deterministic PyTorch-Linear-style init: U(-1/sqrt(fan_in), 1/sqrt(fan_in))
    bound1 = 1.0 / (input_size ** 0.5)
    bound2 = 1.0 / (hidden_size ** 0.5)
    w1 = jax.random.uniform(k1, (hidden_size, input_size), jnp.float32, -bound1, bound1)
    b1 = jax.random.uniform(k2, (hidden_size,), jnp.float32, -bound1, bound1)
    w2 = jax.random.uniform(k3, (num_classes, hidden_size), jnp.float32, -bound2, bound2)
    b2 = jax.random.uniform(k4, (num_classes,), jnp.float32, -bound2, bound2)

    out = classifier_forward(x, w1, b1, w2, b2)
    out = jax.block_until_ready(out)

    # sanity check against pure-JAX f32 reference (bf16 matmuls -> relaxed tol)
    h_ref = jnp.maximum(x @ w1.T + b1, 0.0)
    logits_ref = h_ref @ w2.T + b2
    ref = jax.nn.log_softmax(logits_ref, axis=1)
    assert out.shape == (batch, num_classes)
    max_err = float(jnp.max(jnp.abs(out - ref)))
    assert max_err < 3e-2, f"max abs err {max_err}"
    # rows must be valid log-probabilities
    assert jnp.allclose(jnp.sum(jnp.exp(out), axis=1), 1.0, atol=1e-3)

    print("KERNEL_OK")
</pallas_src>

<mosaic_0001>
module attributes {stable_mosaic.version = 11 : i64} {
  func.func @classifier_kernel(%arg0: i32, %arg1: memref<8x32xf32, #tpu.memory_space<vmem>>, %arg2: memref<128x32xbf16, #tpu.memory_space<vmem>>, %arg3: memref<1x128xf32, #tpu.memory_space<vmem>>, %arg4: memref<128x128xbf16, #tpu.memory_space<vmem>>, %arg5: memref<1x128xf32, #tpu.memory_space<vmem>>, %arg6: memref<8x128xf32, #tpu.memory_space<vmem>>) attributes {dimension_semantics = [#tpu.dimension_semantics<parallel>], iteration_bounds = array<i64: 1>, scalar_prefetch = 0 : i64, scratch_operands = 0 : i64, tpu.core_type = #tpu.core_type<tc>, window_params = [{transform_indices = @transform_0, window_bounds = array<i64: 8, 32>}, {pipeline_mode = #tpu.pipeline_mode<synchronous>, transform_indices = @transform_1, window_bounds = array<i64: 128, 32>}, {pipeline_mode = #tpu.pipeline_mode<synchronous>, transform_indices = @transform_2, window_bounds = array<i64: 1, 128>}, {pipeline_mode = #tpu.pipeline_mode<synchronous>, transform_indices = @transform_3, window_bounds = array<i64: 128, 128>}, {pipeline_mode = #tpu.pipeline_mode<synchronous>, transform_indices = @transform_4, window_bounds = array<i64: 1, 128>}, {transform_indices = @transform_5, window_bounds = array<i64: 8, 128>}]} {
    %c0 = arith.constant 0 : index
    %c0_0 = arith.constant 0 : index
    %0 = vector.load %arg1[%c0, %c0_0] : memref<8x32xf32, #tpu.memory_space<vmem>>, vector<8x32xf32>
    %1 = arith.truncf %0 : vector<8x32xf32> to vector<8x32xbf16>
    %c0_1 = arith.constant 0 : index
    %c0_2 = arith.constant 0 : index
    %2 = vector.load %arg2[%c0_1, %c0_2] : memref<128x32xbf16, #tpu.memory_space<vmem>>, vector<128x32xbf16>
    %cst = arith.constant dense<0.000000e+00> : vector<8x128xf32>
    %3 = tpu.matmul %1, %2, %cst {dimension_numbers = #tpu.dot_dimension_numbers<[1], [1], [0], [0], [0, 0, 1, 0], [], []>} : vector<8x32xbf16>, vector<128x32xbf16>, vector<8x128xf32> -> vector<8x128xf32>
    %c0_3 = arith.constant 0 : index
    %c0_4 = arith.constant 0 : index
    %4 = vector.load %arg3[%c0_3, %c0_4] : memref<1x128xf32, #tpu.memory_space<vmem>>, vector<1x128xf32>
    %5 = vector.broadcast %4 : vector<1x128xf32> to vector<8x128xf32>
    %6 = arith.addf %3, %5 : vector<8x128xf32>
    %cst_5 = arith.constant 0.000000e+00 : f32
    %7 = vector.broadcast %cst_5 : f32 to vector<8x128xf32>
    %8 = arith.maximumf %6, %7 : vector<8x128xf32>
    %9 = arith.truncf %8 : vector<8x128xf32> to vector<8x128xbf16>
    %c0_6 = arith.constant 0 : index
    %c0_7 = arith.constant 0 : index
    %10 = vector.load %arg4[%c0_6, %c0_7] : memref<128x128xbf16, #tpu.memory_space<vmem>>, vector<128x128xbf16>
    %cst_8 = arith.constant dense<0.000000e+00> : vector<8x128xf32>
    %11 = tpu.matmul %9, %10, %cst_8 {dimension_numbers = #tpu.dot_dimension_numbers<[1], [1], [0], [0], [0, 0, 1, 0], [], []>} : vector<8x128xbf16>, vector<128x128xbf16>, vector<8x128xf32> -> vector<8x128xf32>
    %c0_9 = arith.constant 0 : index
    %c0_10 = arith.constant 0 : index
    %12 = vector.load %arg5[%c0_9, %c0_10] : memref<1x128xf32, #tpu.memory_space<vmem>>, vector<1x128xf32>
    %13 = vector.broadcast %12 : vector<1x128xf32> to vector<8x128xf32>
    %14 = arith.addf %11, %13 : vector<8x128xf32>
    %cst_11 = arith.constant dense<0xFF800000> : vector<8xf32>
    %15 = vector.multi_reduction <maximumf>, %14, %cst_11 [1] : vector<8x128xf32> to vector<8xf32>
    %16 = vector.shape_cast %15 : vector<8xf32> to vector<8x1xf32>
    %17 = vector.broadcast %16 : vector<8x1xf32> to vector<8x128xf32>
    %18 = arith.subf %14, %17 : vector<8x128xf32>
    %19 = math.exp %18 : vector<8x128xf32>
    %cst_12 = arith.constant dense<0.000000e+00> : vector<8xf32>
    %20 = vector.multi_reduction <add>, %19, %cst_12 [1] : vector<8x128xf32> to vector<8xf32>
    %21 = vector.shape_cast %20 : vector<8xf32> to vector<8x1xf32>
    %22 = math.log %21 : vector<8x1xf32>
    %23 = arith.addf %16, %22 : vector<8x1xf32>
    %24 = vector.broadcast %23 : vector<8x1xf32> to vector<8x128xf32>
    %25 = arith.subf %14, %24 : vector<8x128xf32>
    %c0_13 = arith.constant 0 : index
    %c0_14 = arith.constant 0 : index
    %26 = vector.load %arg6[%c0_13, %c0_14] : memref<8x128xf32, #tpu.memory_space<vmem>>, vector<8x128xf32>
    tpu.vector_store %arg6[%c0_13, %c0_14], %25 {strides = array<i32>} : memref<8x128xf32, #tpu.memory_space<vmem>>, vector<8x128xf32>,
    return
  }
  func.func @transform_0(%arg0: i32) -> (i32, i32) {
    %c0_i32 = arith.constant 0 : i32
    %c0_i32_0 = arith.constant 0 : i32
    return %arg0, %c0_i32 : i32, i32
  }
  func.func @transform_1(%arg0: i32) -> (i32, i32) {
    %c0_i32 = arith.constant 0 : i32
    %c0_i32_0 = arith.constant 0 : i32
    %c0_i32_1 = arith.constant 0 : i32
    return %c0_i32, %c0_i32_0 : i32, i32
  }
  func.func @transform_2(%arg0: i32) -> (i32, i32) {
    %c0_i32 = arith.constant 0 : i32
    %c0_i32_0 = arith.constant 0 : i32
    %c0_i32_1 = arith.constant 0 : i32
    return %c0_i32, %c0_i32_0 : i32, i32
  }
  func.func @transform_3(%arg0: i32) -> (i32, i32) {
    %c0_i32 = arith.constant 0 : i32
    %c0_i32_0 = arith.constant 0 : i32
    %c0_i32_1 = arith.constant 0 : i32
    return %c0_i32, %c0_i32_0 : i32, i32
  }
  func.func @transform_4(%arg0: i32) -> (i32, i32) {
    %c0_i32 = arith.constant 0 : i32
    %c0_i32_0 = arith.constant 0 : i32
    %c0_i32_1 = arith.constant 0 : i32
    return %c0_i32, %c0_i32_0 : i32, i32
  }
  func.func @transform_5(%arg0: i32) -> (i32, i32) {
    %c0_i32 = arith.constant 0 : i32
    %c0_i32_0 = arith.constant 0 : i32
    return %arg0, %c0_i32 : i32, i32
  }
}

</mosaic_0001>

<bundles_post_ra>
// kernel: tpu_custom_call.1
= control target key start
LH: loop header
LB: loop body
LE: loop exit
PB: predicated region body
PF: predicated region fallthrough
CT: control target
= control target key end

     0   :  { %v418_v1 = vmov 0.0   ;;  %vm87_vm0 = vcmask 261120   ;;  %vm419_vm1 = vmmov 0   ;;  %s529_s0 = inlined_call_operand.vmem [shape: f32[8,32], index: 0, kind: input, shape index: {}]   ;;  %s530_s1 = inlined_call_operand.vmem [shape: bf16[128,32], index: 1, kind: input, shape index: {}]   ;;  %s531_s2 = inlined_call_operand.vmem [shape: f32[1,128], index: 2, kind: input, shape index: {}]   ;;  %s532_s3 = inlined_call_operand.vmem [shape: bf16[128,128], index: 3, kind: input, shape index: {}]   ;;  %s533_s4 = inlined_call_operand.vmem [shape: f32[1,128], index: 4, kind: input, shape index: {}]   ;;  %s534_s5 = inlined_call_operand.hbm [shape: f32[8,128], index: 5, kind: output, shape index: {}]  }
   0x1   :  { %v374_v0 = vld [vmem:[%s530_s1] sm:$0xff]   ;;  %331 = vmatprep.subr.bf16.mxu0 %v418_v1  ;;  %351 = vmatprep.subr.bf16.mxu1 %v418_v1  ;;  %v375_v3 = vld [vmem:[%s530_s1 + $0x8] sm:$0xff]   ;;  %v376_v6 = vld [vmem:[%s530_s1 + $0x10] sm:$0xff]  }
   0x2   :  { %v92_v2 = vsel %vm87_vm0, %v374_v0, 0  ;;  %v95_v4 = vsel %vm87_vm0, %v375_v3, 0  ;;  %v382_v5 = vld [vmem:[%s532_s3] sm:$0xff]   ;;  %347 = vmatprep.mubr.msk.bf16.mxu0 %vm419_vm1, %v418_v1  ;;  %367 = vmatprep.mubr.msk.bf16.mxu1 %vm419_vm1, %v418_v1  ;;  %v383_v7 = vld [vmem:[%s532_s3 + $0x8] sm:$0xff]   ;;  %v98_v8 = vsel %vm87_vm0, %v376_v6, 0 }
   0x3   :  { %332 = vmatpush3.bf16.xpose.msra.mxu0 %v92_v2  ;;  %352 = vmatpush3.bf16.xpose.msra.mxu1 %v382_v5 }
   0x4   :  { %333 = vmatprep.subr.bf16.mxu0 %v418_v1  ;;  %353 = vmatprep.subr.bf16.mxu1 %v418_v1 }
   0xb   :  { %334 = vmatpush3.bf16.xpose.msra.mxu0 %v95_v4 }
   0xc   :  { %335 = vmatprep.subr.bf16.mxu0 %v418_v1 }
   0xd   :  { %10 = vsyncpa [#allocation3], 0  ;;  %354 = vmatpush3.bf16.xpose.msra.mxu1 %v383_v7  ;;  %v377_v9 = vld [vmem:[%s530_s1 + $0x18] sm:$0xff]   ;;  %v384_v10 = vld [vmem:[%s532_s3 + $0x10] sm:$0xff]  }
   0xe   :  { %355 = vmatprep.subr.bf16.mxu1 %v418_v1  ;;  %v101_v11 = vsel %vm87_vm0, %v377_v9, 0  ;;  %v378_v12 = vld [vmem:[%s530_s1 + $0x20] sm:$0xff]   ;;  %v385_v13 = vld [vmem:[%s532_s3 + $0x18] sm:$0xff]   ;;  %v379_v15 = vld [vmem:[%s530_s1 + $0x28] sm:$0xff]  }
   0xf   :  { %v104_v14 = vsel %vm87_vm0, %v378_v12, 0  ;;  %v386_v16 = vld [vmem:[%s532_s3 + $0x20] sm:$0xff]   ;;  %v107_v17 = vsel %vm87_vm0, %v379_v15, 0  ;;  %v380_v18 = vld [vmem:[%s530_s1 + $0x30] sm:$0xff]   ;;  %v387_v19 = vld [vmem:[%s532_s3 + $0x28] sm:$0xff]  }
  0x10   :  { %v110_v20 = vsel %vm87_vm0, %v380_v18, 0  ;;  %v381_v21 = vld [vmem:[%s530_s1 + $0x38] sm:$0xff]   ;;  %v388_v22 = vld [vmem:[%s532_s3 + $0x30] sm:$0xff]   ;;  %v22_v24 = vld [vmem:[%s529_s0] sm:$0xff] }
  0x11   :  { %v113_v23 = vsel %vm87_vm0, %v381_v21, 0  ;;  %v23_v25 = vpack.c.bf16 %v22_v24, %v22_v24  ;;  %v389_v26 = vld [vmem:[%s532_s3 + $0x38] sm:$0xff]   ;;  %v294_v27 = vld [vmem:[%s531_s2] ss:$0 sm:$0xff]  ;;  %s420_s2 = smov [#allocation2]  }
  0x12   :  { %v304_v35 = vld [vmem:[%s533_s4] ss:$0 sm:$0xff]  ;;  %s286_s3 = sshll.u32 %s420_s2, 4  ;;  %s287_s3 = int_to_ptr.vmem [resolvable:$true] %s286_s3 }
  0x13   :  { %336 = vmatpush3.bf16.xpose.msra.mxu0 %v98_v8  ;;  %s394_s4 = scalar_lea.vmem %s287_s3, 128  ;;  %p399_p1 = scmp.lt.s32.totalorder %s287_s3, %s287_s3 }
  0x14   :  { %337 = vmatprep.subr.bf16.mxu0 %v418_v1  ;;  %p395_p0 = scmp.ne.s32.totalorder %s287_s3, %s394_s4  ;;  %p400_p2 = scmp.lt.s32.totalorder %s394_s4, %s394_s4 }
  0x15   :  { %356 = vmatpush3.bf16.xpose.msra.mxu1 %v384_v10 }
  0x16   :  { %357 = vmatprep.subr.bf16.mxu1 %v418_v1  ;;  %p401_p3 = por %p400_p2, %p399_p1 }
  0x18   :  { %p402_p4 = pnand %p401_p3, %p395_p0 }
  0x1b   :  { %338 = vmatpush3.bf16.xpose.msra.mxu0 %v101_v11 }
  0x1c   :  { %339 = vmatprep.subr.bf16.mxu0 %v418_v1 }
  0x1d   :  { %358 = vmatpush3.bf16.xpose.msra.mxu1 %v385_v13 }
  0x1e   :  { %359 = vmatprep.subr.bf16.mxu1 %v418_v1 }
  0x23   :  { %340 = vmatpush3.bf16.xpose.msra.mxu0 %v104_v14 }
  0x24   :  { %341 = vmatprep.subr.bf16.mxu0 %v418_v1 }
  0x25   :  { %360 = vmatpush3.bf16.xpose.msra.mxu1 %v386_v16 }
  0x26   :  { %361 = vmatprep.subr.bf16.mxu1 %v418_v1 }
  0x2b   :  { %342 = vmatpush3.bf16.xpose.msra.mxu0 %v107_v17 }
  0x2c   :  { %343 = vmatprep.subr.bf16.mxu0 %v418_v1 }
  0x2d   :  { %362 = vmatpush3.bf16.xpose.msra.mxu1 %v387_v19 }
  0x2e   :  { %363 = vmatprep.subr.bf16.mxu1 %v418_v1 }
  0x33   :  { %344 = vmatpush3.bf16.xpose.msra.mxu0 %v110_v20 }
  0x34   :  { %345 = vmatprep.subr.bf16.mxu0 %v418_v1 }
  0x35   :  { %364 = vmatpush3.bf16.xpose.msra.mxu1 %v388_v22 }
  0x36   :  { %365 = vmatprep.subr.bf16.mxu1 %v418_v1 }
  0x3b   :  { %346 = vmatpush3.bf16.xpose.msra.mxu0 %v113_v23 }
  0x3d   :  { %366 = vmatpush3.bf16.xpose.msra.mxu1 %v389_v26 }
  0x42   :  { %348 = vmatmul.mubr.msk.bf16.vlgmr.msra.gmra.mrb[0].mxu0 %vm87_vm0, %v23_v25 }
 0x115   :  { %v149_v28 = vpop.f32.mrb[0].mxu0 }
 0x116   :  { %v150_v29 = vadd.f32 %v294_v27, %v149_v28  ;;  %v349_v30 = vpop.f32.mrb[1].mxu0 }
 0x117   :  { %v152_v31 = vpop.f32.mrb[2].mxu0 }
 0x118   :  { %v155_v32 = vmax.f32 %v150_v29, 0.0  ;;  %v350_v33 = vpop.f32.mrb[3].mxu0 }
 0x11a   :  { %v156_v34 = vpack.c.bf16 %v155_v32, %v155_v32 }
 0x11c   :  { %368 = vmatmul.mubr.bf16.vlgmr.msra.gmra.mrb[0].mxu1 %v156_v34 }
 0x1ef   :  { %v262_v36 = vpop.f32.mrb[0].mxu1 }
 0x1f0   :  { %v263_v37 = vadd.f32 %v304_v35, %v262_v36  ;;  %v369_v38 = vpop.f32.mrb[1].mxu1 }
 0x1f1   :  { %v265_v39 = vpop.f32.mrb[2].mxu1 }
 0x1f2   :  { %268 = vmax.xlane.f32.xlu0 %v263_v37  ;;  %v370_v40 = vpop.f32.mrb[3].mxu1 }
 0x27f   :  { %v269_v41 = vpop.xlane.xlu0 %268 }
 0x280   :  { %v270_v42 = vsub.f32 %v263_v37, %v269_v41 }
 0x282   :  { %v271_v43 = vmul.f32 1.442695, %v270_v42 }
 0x284   :  { %390 = vpow2.f32 %v271_v43 }
 0x28e   :  { %v391_v44 = vpop.eup %390 }
 0x28f   :  { %273 = vadd.xlane.f32.xlu0 %v391_v44 }
 0x31c   :  { %v274_v45 = vpop.xlane.xlu0 %273 }
 0x31d   :  { %392 = vlog2.f32 %v274_v45 }
 0x327   :  { %v393_v46 = vpop.eup %392 }
 0x328   :  { %v276_v47 = vmul.f32 0.6931472, %v393_v46 }
 0x32a   :  { %v277_v48 = vadd.f32 %v276_v47, %v269_v41 }
 0x32c   :  { %v278_v49 = vsub.f32 %v263_v37, %v277_v48 }
 0x32e   :  { %279 = vst [vmem:[#allocation2] sm:$0xff] %v278_v49 }
 0x32f   :  { %405 = shalt.err (!%p402_p4)
}
 0x330   :  { %s406_s6 = scalar_lea.hbm %s534_s5, 128 }
 0x331   :  { %p407_p5 = scmp.ne.s32.totalorder %s534_s5, %s406_s6  ;;  %p410_p6 = scmp.lt.u32.totalorder %s406_s6, %s534_s5 }
 0x333   :  { %p412_p7 = pnand %p410_p6, %p407_p5 }
 0x335   :  { %415 = shalt.err (!%p412_p7)
}
 0x336   :  { %289 = dma.vmem_to_hbm [thread:$0]  %s287_s3, 128, %s534_s5, [#allocation3]  }
 0x337   :  { %416 = dma.done.wait [#allocation3], 128  }
 0x338   :  { %417 = vsyncadd [#allocation3], 4294967168 }
 0x339   :  { %293 = vsyncpa [#allocation3], 1 }

</bundles_post_ra>
